<compile_context>
chip_gen: v5e
topology: v5e:2x2
jax: 0.10.0
libtpu: 0.0.40
codegen_flags: <defaults>
</compile_context>

<pallas_src>
import functools
import math

import jax
import jax.numpy as jnp
from jax.experimental import pallas as pl
from jax.experimental.pallas import tpu as pltpu

_MIB = 1024 * 1024
_INV_SQRT2 = 0.7071067811865476


# ---------------------------------------------------------------------------
# Kernels
# ---------------------------------------------------------------------------

def _time_embed_kernel(x_ref, pos_ref, t_ref, w1_ref, b1_ref, w2_ref, b2_ref,
                       o_ref, *, mxu_bf16, approx_gelu):
    """One (tB, tS, tH) tile of: out = x + pos + Linear2(GELU(Linear1(t)))."""
    tB, tS, tH = x_ref.shape
    x = x_ref[...].astype(jnp.float32)            # (tB, tS, tH)
    pos = pos_ref[...].astype(jnp.float32)        # (1,  tS, tH)

    # Time column: whole (padded) array is VMEM-resident; slice this tile.
    s0 = pl.multiple_of(pl.program_id(1) * tS, tS)
    b0 = pl.multiple_of(pl.program_id(2) * tB, tB)
    t = t_ref[pl.ds(b0, tB), pl.ds(s0, tS), :]    # (tB, tS, 1), f32

    # Linear(1, H//2): broadcast outer product on the VPU (no relayout).
    h = t * w1_ref[...] + b1_ref[...]             # (tB, tS, H2)

    if approx_gelu:
        h = jax.nn.gelu(h, approximate=True)      # tanh -> EUP slot
    else:
        # Exact erf GELU (matches torch.nn.GELU() default).
        h = 0.5 * h * (1.0 + jax.lax.erf(h * _INV_SQRT2))

    # Linear(H//2, H) on the MXU, f32 accumulation.  Every (batch, seq) row is
    # independent (contraction is only along H//2), so block-padding garbage in
    # edge rows/columns never leaks into valid outputs and is dropped on
    # write-back.  (Keep this property if the kernel is ever extended with a
    # cross-row reduction.)
    h2d = h.reshape(tB * tS, -1)
    if mxu_bf16:
        h2d = h2d.astype(jnp.bfloat16)
    code = jnp.dot(h2d, w2_ref[...], preferred_element_type=jnp.float32)
    code = code.reshape(tB, tS, -1) + b2_ref[...]

    o_ref[...] = (x + pos + code).astype(o_ref.dtype)


def _pos_only_kernel(x_ref, pos_ref, o_ref):
    # x block (B, tC), pos block (1, tC): lane-dense broadcast add.
    o_ref[...] = (x_ref[...].astype(jnp.float32)
                  + pos_ref[...].astype(jnp.float32)).astype(o_ref.dtype)


# ---------------------------------------------------------------------------
# Hardware / tiling helpers
# ---------------------------------------------------------------------------

def _vmem_limit_bytes():
    cap = 64 * _MIB                     # conservative fallback (v7x: 64 MiB/TC)
    try:
        cap = int(getattr(pltpu.get_tpu_info(), "vmem_capacity_bytes", cap)) or cap
    except Exception:
        pass
    return int(max(32 * _MIB, min(cap * 3 // 4, 100 * _MIB)))


def _num_tensorcores():
    try:
        info = pltpu.get_tpu_info()
        for attr in ("num_cores", "core_count", "num_tensorcores",
                     "tensorcores_per_chip", "cores_per_chip"):
            v = getattr(info, attr, None)
            if v:
                return max(1, int(v))
    except Exception:
        pass
    try:
        return max(1, int(getattr(jax.devices()[0], "num_cores", 1) or 1))
    except Exception:
        return 1


def _single_buffer_supported():
    if not hasattr(pl, "Buffered"):
        return False
    try:
        pl.BlockSpec((8, 128), lambda i: (0, 0), pipeline_mode=pl.Buffered(1))
        return True
    except Exception:
        return False


def _pick_tiles(B, S, H, H2, budget, act_el, w2_el, wbuf):
    """Choose (tB, tS, tH): batch fold, sequence tile, output-column tile."""
    # H (output-column) tile: only when w2 alone threatens the VMEM budget
    # (large H on v7x's 64 MiB VMEM).  No-op for typical hidden dims.
    tH = H
    if H > 128 and H2 * H * w2_el * wbuf > budget // 3:
        cols = max(128, ((budget // 3) // max(1, H2 * w2_el * wbuf)) // 128 * 128)
        tH = cols
        for cand in range(cols, 127, -128):          # prefer a divisor of H
            if H % cand == 0:
                tH = cand
                break

    weight_bytes = (H2 * tH * w2_el + (2 * H2 + tH) * 4) * wbuf
    t_bytes = (B + 8) * (S + 8) * 4 * wbuf           # resident time column
    avail = max(budget - weight_bytes - t_bytes - 2 * _MIB, 256 * 1024)

    # Bytes per folded (batch, seq) row of width tH: double-buffered x/pos/out
    # blocks + f32 temporaries + GELU intermediate.
    bytes_per_row = 6 * tH * act_el + 16 * tH + 8 * H2 + 16
    vmem_rows = max(8, avail // bytes_per_row)
    # Target a ~4 MiB x-block (HBM-roofline plateau), VMEM permitting -- no
    # hard 512-row cap.
    target_rows = max(256, (4 * _MIB) // max(1, tH * act_el))
    rows = int(min(vmem_rows, target_rows))
    rows = max(8, (rows // 8) * 8)

    if S <= rows:
        tS = S
        tB = max(1, min(B, rows // max(1, S)))        # fold batch rows
    else:
        tB = 1
        tS = rows
        for cand in range(rows, 7, -8):               # prefer a divisor of S
            if S % cand == 0 and cand * 2 >= rows:
                tS = cand
                break
    return tB, tS, tH


def _pick_pos_tile(B, L, budget, act_el):
    """Lane-dense column tile for the flattened (B, S*H) add path."""
    if L <= 1024:
        return L
    bytes_per_col = 4 * B * act_el + 2 * act_el + (2 * B + 2) * 4
    cap = max(1024, budget // bytes_per_col)
    if _num_tensorcores() >= 2:
        cap = min(cap, -(-L // 2))     # >=2 steps only when 2 TCs exist (v7x)
    if cap >= L:
        return L
    return max(128, (min(cap, L) // 128) * 128)


# ---------------------------------------------------------------------------
# Wrapper
# ---------------------------------------------------------------------------

def time_embedding_forward(x, params, time_values=None, *,
                           mxu_bf16=False, approx_gelu=False,
                           _force_tiles=None):
    """x: (B, S, H); time_values: optional (B, S).

    Output dtype == x.dtype (pass bf16 activations to halve HBM traffic).
    Default math matches the PyTorch module exactly (erf GELU, f32 matmul);
    mxu_bf16 / approx_gelu opt into the faster path.
    """
    B, S, H = x.shape
    out_dtype = x.dtype
    act_el = jnp.dtype(out_dtype).itemsize
    pos = params["position_embedding"][:, :S, :].astype(out_dtype)

    vmem_limit = _vmem_limit_bytes()
    budget = max(vmem_limit - 4 * _MIB, 16 * _MIB)

    if time_values is None:
        # Flattened lane-dense elementwise add (avoids masked partial stores
        # when H is not a multiple of 128).
        L = S * H
        x2 = x.reshape(B, L)
        pos2 = pos.reshape(1, L)
        tC = _pick_pos_tile(B, L, budget, act_el)
        out2 = pl.pallas_call(
            _pos_only_kernel,
            out_shape=jax.ShapeDtypeStruct((B, L), out_dtype),
            grid=(pl.cdiv(L, tC),),
            in_specs=[
                pl.BlockSpec((B, tC), lambda c: (0, c)),   # x slab
                pl.BlockSpec((1, tC), lambda c: (0, c)),   # pos slab (shared)
            ],
            out_specs=pl.BlockSpec((B, tC), lambda c: (0, c)),
            compiler_params=pltpu.CompilerParams(
                dimension_semantics=("parallel",),
                vmem_limit_bytes=vmem_limit),
        )(x2, pos2)
        return out2.reshape(B, S, H)

    H2 = params["w2"].shape[0]
    w2_dtype = jnp.bfloat16 if mxu_bf16 else jnp.float32
    w2_el = jnp.dtype(w2_dtype).itemsize

    single_buf = _single_buffer_supported()
    if _force_tiles is not None:
        tB, tS, tH = _force_tiles
    else:
        tB, tS, tH = _pick_tiles(B, S, H, H2, budget, act_el, w2_el,
                                 wbuf=1 if single_buf else 2)

    num_h = pl.cdiv(H, tH)
    num_s = pl.cdiv(S, tS)
    num_b = pl.cdiv(B, tB)

    # Time column (f32, VMEM-resident for the whole call).  Padded up to the
    # grid extent so the in-kernel pl.ds slice never leaves the buffer.
    Bp, Sp = num_b * tB, num_s * tS
    t = time_values.astype(jnp.float32).reshape(B, S, 1)
    if (Bp, Sp) != (B, S):
        t = jnp.pad(t, ((0, Bp - B), (0, Sp - S), (0, 0)))

    w1 = params["w1"].reshape(1, H2).astype(jnp.float32)
    b1 = params["b1"].reshape(1, H2).astype(jnp.float32)
    w2 = params["w2"].astype(w2_dtype)
    b2 = params["b2"].reshape(1, H).astype(jnp.float32)

    kernel = functools.partial(_time_embed_kernel, mxu_bf16=mxu_bf16,
                               approx_gelu=approx_gelu)

    def call(use_single_buffer):
        def const_spec(shape, index_map):
            if use_single_buffer:
                return pl.BlockSpec(shape, index_map,
                                    pipeline_mode=pl.Buffered(1))
            return pl.BlockSpec(shape, index_map)

        # Grid order (h, s, b): b varies fastest, so the shared pos tile is
        # only re-DMA'd per (h, s), w2/b2 tiles only per h, and the constant
        # w1/b1/time blocks only once.
        in_specs = [
            pl.BlockSpec((tB, tS, tH), lambda h, s, b: (b, s, h)),   # x
            pl.BlockSpec((1, tS, tH), lambda h, s, b: (0, s, h)),    # pos
            const_spec((Bp, Sp, 1), lambda h, s, b: (0, 0, 0)),      # time (resident)
            const_spec((1, H2), lambda h, s, b: (0, 0)),             # w1
            const_spec((1, H2), lambda h, s, b: (0, 0)),             # b1
            const_spec((H2, tH), lambda h, s, b: (0, h)),            # w2
            const_spec((1, tH), lambda h, s, b: (0, h)),             # b2
        ]
        return pl.pallas_call(
            kernel,
            out_shape=jax.ShapeDtypeStruct((B, S, H), out_dtype),
            grid=(num_h, num_s, num_b),
            in_specs=in_specs,
            out_specs=pl.BlockSpec((tB, tS, tH), lambda h, s, b: (b, s, h)),
            compiler_params=pltpu.CompilerParams(
                dimension_semantics=("parallel", "parallel", "parallel"),
                vmem_limit_bytes=vmem_limit),
        )(x, pos, t, w1, b1, w2, b2)

    if single_buf:
        try:
            return call(True)
        except Exception:      # pl.Buffered(1) rejected -> default buffering
            pass
    return call(False)


# ---------------------------------------------------------------------------
# Params + reference
# ---------------------------------------------------------------------------

def init_params(key, hidden_dim, max_len=512):
    """Parameter init mirroring the module's shapes (pos-emb made nonzero so
    the position-add path is exercised)."""
    h2 = hidden_dim // 2
    k0, k1, k2, k3, k4 = jax.random.split(key, 5)
    return {
        "position_embedding": 0.02 * jax.random.normal(
            k0, (1, max_len, hidden_dim), jnp.float32),
        "w1": jax.random.normal(k1, (1, h2), jnp.float32),
        "b1": 0.1 * jax.random.normal(k2, (h2,), jnp.float32),
        "w2": jax.random.normal(k3, (h2, hidden_dim), jnp.float32) / math.sqrt(h2),
        "b2": 0.1 * jax.random.normal(k4, (hidden_dim,), jnp.float32),
    }


def _reference_forward(x, params, time_values=None):
    S = x.shape[1]
    out = x + params["position_embedding"][:, :S, :]
    if time_values is not None:
        t = time_values.astype(jnp.float32)[..., None]            # (B, S, 1)
        h = t * params["w1"].reshape(1, 1, -1) + params["b1"]     # (B, S, H//2)
        h = jax.nn.gelu(h, approximate=False)
        code = jnp.einsum("bsk,kh->bsh", h, params["w2"],
                          precision=jax.lax.Precision.HIGHEST) + params["b2"]
        out = out + code
    return out


if __name__ == "__main__":
    key = jax.random.PRNGKey(0)
    kp, kx, kt = jax.random.split(key, 3)

    # Small shapes consistent with the module: batch=2, seq=8, hidden=32.
    B, S, H, MAX_LEN = 2, 8, 32, 512
    params = init_params(kp, H, MAX_LEN)
    x = jax.random.normal(kx, (B, S, H), jnp.float32)
    tv = jax.random.uniform(kt, (B, S), jnp.float32) * 10.0

    ref = _reference_forward(x, params, tv)

    # 1) Exact path (default: erf GELU, f32 MXU matmul).
    out = jax.block_until_ready(time_embedding_forward(x, params, tv))
    assert out.shape == (B, S, H)
    assert jnp.allclose(out, ref, atol=5e-3, rtol=1e-3), "exact path mismatch"

    # 2) Fast path (bf16 matmul inputs + tanh GELU): looser tolerance (bf16
    #    rounding of the second Linear's inputs + tanh-vs-erf GELU).
    out_fast = jax.block_until_ready(
        time_embedding_forward(x, params, tv, mxu_bf16=True, approx_gelu=True))
    assert out_fast.shape == (B, S, H)
    assert jnp.allclose(out_fast, ref, atol=0.4, rtol=5e-2), "fast path mismatch"

    # 3) bf16 activation I/O (halves HBM traffic; adds still f32 in-kernel).
    x_bf = x.astype(jnp.bfloat16)
    ref_bf = _reference_forward(x_bf.astype(jnp.float32), params, tv)
    out_bf = jax.block_until_ready(time_embedding_forward(x_bf, params, tv))
    assert out_bf.dtype == jnp.bfloat16
    assert jnp.allclose(out_bf.astype(jnp.float32), ref_bf,
                        atol=0.25, rtol=2e-2), "bf16 I/O path mismatch"

    # 4) time_values=None path (flattened lane-dense add).
    out_pos = jax.block_until_ready(time_embedding_forward(x, params, None))
    assert jnp.allclose(out_pos, _reference_forward(x, params, None),
                        atol=1e-6, rtol=1e-6), "no-time path mismatch"

    # 5) Multi-block grid with edge padding on both S and B (forced tiles).
    B2, S2, Hd2 = 3, 20, 32
    p2 = init_params(kp, Hd2, 64)
    x2 = jax.random.normal(kx, (B2, S2, Hd2), jnp.float32)
    tv2 = jax.random.uniform(kt, (B2, S2), jnp.float32) * 10.0
    out2 = jax.block_until_ready(
        time_embedding_forward(x2, p2, tv2, _force_tiles=(2, 8, Hd2)))
    assert jnp.allclose(out2, _reference_forward(x2, p2, tv2),
                        atol=5e-3, rtol=1e-3), "padded multi-block mismatch"

    # 6) H-tiled weights path (exercises the large-H / v7x VMEM guard).
    B3, S3, H3 = 2, 16, 256
    p3 = init_params(kp, H3, 64)
    x3 = jax.random.normal(kx, (B3, S3, H3), jnp.float32)
    tv3 = jax.random.uniform(kt, (B3, S3), jnp.float32) * 10.0
    out3 = jax.block_until_ready(
        time_embedding_forward(x3, p3, tv3, _force_tiles=(2, 16, 128)))
    assert jnp.allclose(out3, _reference_forward(x3, p3, tv3),
                        atol=5e-3, rtol=1e-3), "H-tiled path mismatch"

    print("KERNEL_OK")
</pallas_src>

<mosaic_0001>
module attributes {stable_mosaic.version = 11 : i64} {
  func.func @_time_embed_kernel(%arg0: i32, %arg1: i32, %arg2: i32, %arg3: memref<2x8x32xf32, #tpu.memory_space<vmem>>, %arg4: memref<1x8x32xf32, #tpu.memory_space<vmem>>, %arg5: memref<2x8x1xf32, #tpu.memory_space<vmem>>, %arg6: memref<1x16xf32, #tpu.memory_space<vmem>>, %arg7: memref<1x16xf32, #tpu.memory_space<vmem>>, %arg8: memref<16x32xf32, #tpu.memory_space<vmem>>, %arg9: memref<1x32xf32, #tpu.memory_space<vmem>>, %arg10: memref<2x8x32xf32, #tpu.memory_space<vmem>>) attributes {dimension_semantics = [#tpu.dimension_semantics<parallel>, #tpu.dimension_semantics<parallel>, #tpu.dimension_semantics<parallel>], iteration_bounds = array<i64: 1, 1, 1>, scalar_prefetch = 0 : i64, scratch_operands = 0 : i64, tpu.core_type = #tpu.core_type<tc>, window_params = [{transform_indices = @transform_0, window_bounds = array<i64: 2, 8, 32>}, {transform_indices = @transform_1, window_bounds = array<i64: 1, 8, 32>}, {pipeline_mode = #tpu.pipeline_mode<synchronous>, transform_indices = @transform_2, window_bounds = array<i64: 2, 8, 1>}, {pipeline_mode = #tpu.pipeline_mode<synchronous>, transform_indices = @transform_3, window_bounds = array<i64: 1, 16>}, {pipeline_mode = #tpu.pipeline_mode<synchronous>, transform_indices = @transform_4, window_bounds = array<i64: 1, 16>}, {pipeline_mode = #tpu.pipeline_mode<synchronous>, transform_indices = @transform_5, window_bounds = array<i64: 16, 32>}, {pipeline_mode = #tpu.pipeline_mode<synchronous>, transform_indices = @transform_6, window_bounds = array<i64: 1, 32>}, {transform_indices = @transform_7, window_bounds = array<i64: 2, 8, 32>}]} {
    %c0 = arith.constant 0 : index
    %c0_0 = arith.constant 0 : index
    %c0_1 = arith.constant 0 : index
    %0 = vector.load %arg3[%c0, %c0_0, %c0_1] : memref<2x8x32xf32, #tpu.memory_space<vmem>>, vector<2x8x32xf32>
    %c0_2 = arith.constant 0 : index
    %c0_3 = arith.constant 0 : index
    %c0_4 = arith.constant 0 : index
    %1 = vector.load %arg4[%c0_2, %c0_3, %c0_4] : memref<1x8x32xf32, #tpu.memory_space<vmem>>, vector<1x8x32xf32>
    %c8_i32 = arith.constant 8 : i32
    %2 = arith.muli %arg1, %c8_i32 : i32
    %3 = tpu.assume_multiple %2, 8 : i32
    %c2_i32 = arith.constant 2 : i32
    %4 = arith.muli %arg2, %c2_i32 : i32
    %5 = tpu.assume_multiple %4, 2 : i32
    %6 = arith.index_cast %5 : i32 to index
    %7 = arith.index_cast %3 : i32 to index
    %c0_5 = arith.constant 0 : index
    %8 = vector.load %arg5[%6, %7, %c0_5] : memref<2x8x1xf32, #tpu.memory_space<vmem>>, vector<2x8x1xf32>
    %c0_6 = arith.constant 0 : index
    %c0_7 = arith.constant 0 : index
    %9 = vector.load %arg6[%c0_6, %c0_7] : memref<1x16xf32, #tpu.memory_space<vmem>>, vector<1x16xf32>
    %10 = vector.shape_cast %9 : vector<1x16xf32> to vector<1x1x16xf32>
    %11 = vector.broadcast %8 : vector<2x8x1xf32> to vector<2x8x16xf32>
    %12 = vector.broadcast %10 : vector<1x1x16xf32> to vector<2x8x16xf32>
    %13 = arith.mulf %11, %12 : vector<2x8x16xf32>
    %c0_8 = arith.constant 0 : index
    %c0_9 = arith.constant 0 : index
    %14 = vector.load %arg7[%c0_8, %c0_9] : memref<1x16xf32, #tpu.memory_space<vmem>>, vector<1x16xf32>
    %15 = vector.shape_cast %14 : vector<1x16xf32> to vector<1x1x16xf32>
    %16 = vector.broadcast %15 : vector<1x1x16xf32> to vector<2x8x16xf32>
    %17 = arith.addf %13, %16 : vector<2x8x16xf32>
    %cst = arith.constant 5.000000e-01 : f32
    %18 = vector.broadcast %cst : f32 to vector<2x8x16xf32>
    %19 = arith.mulf %18, %17 : vector<2x8x16xf32>
    %cst_10 = arith.constant 0.707106769 : f32
    %20 = vector.broadcast %cst_10 : f32 to vector<2x8x16xf32>
    %21 = arith.mulf %17, %20 : vector<2x8x16xf32>
    %22 = math.erf %21 : vector<2x8x16xf32>
    %cst_11 = arith.constant 1.000000e+00 : f32
    %23 = vector.broadcast %cst_11 : f32 to vector<2x8x16xf32>
    %24 = arith.addf %23, %22 : vector<2x8x16xf32>
    %25 = arith.mulf %19, %24 : vector<2x8x16xf32>
    %26 = vector.shape_cast %25 : vector<2x8x16xf32> to vector<16x16xf32>
    %c0_12 = arith.constant 0 : index
    %c0_13 = arith.constant 0 : index
    %27 = vector.load %arg8[%c0_12, %c0_13] : memref<16x32xf32, #tpu.memory_space<vmem>>, vector<16x32xf32>
    %cst_14 = arith.constant dense<0.000000e+00> : vector<16x32xf32>
    %28 = tpu.matmul %26, %27, %cst_14 {dimension_numbers = #tpu.dot_dimension_numbers<[1], [0], [0], [1], [0, 0, 1, 1], [], []>} : vector<16x16xf32>, vector<16x32xf32>, vector<16x32xf32> -> vector<16x32xf32>
    %29 = vector.shape_cast %28 : vector<16x32xf32> to vector<2x8x32xf32>
    %c0_15 = arith.constant 0 : index
    %c0_16 = arith.constant 0 : index
    %30 = vector.load %arg9[%c0_15, %c0_16] : memref<1x32xf32, #tpu.memory_space<vmem>>, vector<1x32xf32>
    %31 = vector.shape_cast %30 : vector<1x32xf32> to vector<1x1x32xf32>
    %32 = vector.broadcast %31 : vector<1x1x32xf32> to vector<2x8x32xf32>
    %33 = arith.addf %29, %32 : vector<2x8x32xf32>
    %34 = vector.broadcast %1 : vector<1x8x32xf32> to vector<2x8x32xf32>
    %35 = arith.addf %0, %34 : vector<2x8x32xf32>
    %36 = arith.addf %35, %33 : vector<2x8x32xf32>
    %c0_17 = arith.constant 0 : index
    %c0_18 = arith.constant 0 : index
    %c0_19 = arith.constant 0 : index
    %37 = vector.load %arg10[%c0_17, %c0_18, %c0_19] : memref<2x8x32xf32, #tpu.memory_space<vmem>>, vector<2x8x32xf32>
    tpu.vector_store %arg10[%c0_17, %c0_18, %c0_19], %36 {strides = array<i32>} : memref<2x8x32xf32, #tpu.memory_space<vmem>>, vector<2x8x32xf32>,
    return
  }
  func.func @transform_0(%arg0: i32, %arg1: i32, %arg2: i32) -> (i32, i32, i32) {
    %c0_i32 = arith.constant 0 : i32
    return %arg2, %arg1, %arg0 : i32, i32, i32
  }
  func.func @transform_1(%arg0: i32, %arg1: i32, %arg2: i32) -> (i32, i32, i32) {
    %c0_i32 = arith.constant 0 : i32
    %c0_i32_0 = arith.constant 0 : i32
    return %c0_i32, %arg1, %arg0 : i32, i32, i32
  }
  func.func @transform_2(%arg0: i32, %arg1: i32, %arg2: i32) -> (i32, i32, i32) {
    %c0_i32 = arith.constant 0 : i32
    %c0_i32_0 = arith.constant 0 : i32
    %c0_i32_1 = arith.constant 0 : i32
    %c0_i32_2 = arith.constant 0 : i32
    return %c0_i32, %c0_i32_0, %c0_i32_1 : i32, i32, i32
  }
  func.func @transform_3(%arg0: i32, %arg1: i32, %arg2: i32) -> (i32, i32) {
    %c0_i32 = arith.constant 0 : i32
    %c0_i32_0 = arith.constant 0 : i32
    %c0_i32_1 = arith.constant 0 : i32
    return %c0_i32, %c0_i32_0 : i32, i32
  }
  func.func @transform_4(%arg0: i32, %arg1: i32, %arg2: i32) -> (i32, i32) {
    %c0_i32 = arith.constant 0 : i32
    %c0_i32_0 = arith.constant 0 : i32
    %c0_i32_1 = arith.constant 0 : i32
    return %c0_i32, %c0_i32_0 : i32, i32
  }
  func.func @transform_5(%arg0: i32, %arg1: i32, %arg2: i32) -> (i32, i32) {
    %c0_i32 = arith.constant 0 : i32
    %c0_i32_0 = arith.constant 0 : i32
    return %c0_i32, %arg0 : i32, i32
  }
  func.func @transform_6(%arg0: i32, %arg1: i32, %arg2: i32) -> (i32, i32) {
    %c0_i32 = arith.constant 0 : i32
    %c0_i32_0 = arith.constant 0 : i32
    return %c0_i32, %arg0 : i32, i32
  }
  func.func @transform_7(%arg0: i32, %arg1: i32, %arg2: i32) -> (i32, i32, i32) {
    %c0_i32 = arith.constant 0 : i32
    return %arg2, %arg1, %arg0 : i32, i32, i32
  }
}

module attributes {stable_mosaic.version = 11 : i64} {
  func.func @_time_embed_kernel(%arg0: i32, %arg1: i32, %arg2: i32, %arg3: memref<2x8x32xf32, #tpu.memory_space<vmem>>, %arg4: memref<1x8x32xf32, #tpu.memory_space<vmem>>, %arg5: memref<2x8x1xf32, #tpu.memory_space<vmem>>, %arg6: memref<1x16xf32, #tpu.memory_space<vmem>>, %arg7: memref<1x16xf32, #tpu.memory_space<vmem>>, %arg8: memref<16x32xf32, #tpu.memory_space<vmem>>, %arg9: memref<1x32xf32, #tpu.memory_space<vmem>>, %arg10: memref<2x8x32xf32, #tpu.memory_space<vmem>>) attributes {dimension_semantics = [#tpu.dimension_semantics<parallel>, #tpu.dimension_semantics<parallel>, #tpu.dimension_semantics<parallel>], iteration_bounds = array<i64: 1, 1, 1>, scalar_prefetch = 0 : i64, scratch_operands = 0 : i64, tpu.core_type = #tpu.core_type<tc>, window_params = [{transform_indices = @transform_0, window_bounds = array<i64: 2, 8, 32>}, {transform_indices = @transform_1, window_bounds = array<i64: 1, 8, 32>}, {pipeline_mode = #tpu.pipeline_mode<synchronous>, transform_indices = @transform_2, window_bounds = array<i64: 2, 8, 1>}, {pipeline_mode = #tpu.pipeline_mode<synchronous>, transform_indices = @transform_3, window_bounds = array<i64: 1, 16>}, {pipeline_mode = #tpu.pipeline_mode<synchronous>, transform_indices = @transform_4, window_bounds = array<i64: 1, 16>}, {transform_indices = @transform_5, window_bounds = array<i64: 16, 32>}, {transform_indices = @transform_6, window_bounds = array<i64: 1, 32>}, {transform_indices = @transform_7, window_bounds = array<i64: 2, 8, 32>}]} {
    %c0 = arith.constant 0 : index
    %c0_0 = arith.constant 0 : index
    %c0_1 = arith.constant 0 : index
    %0 = vector.load %arg3[%c0, %c0_0, %c0_1] : memref<2x8x32xf32, #tpu.memory_space<vmem>>, vector<2x8x32xf32>
    %c0_2 = arith.constant 0 : index
    %c0_3 = arith.constant 0 : index
    %c0_4 = arith.constant 0 : index
    %1 = vector.load %arg4[%c0_2, %c0_3, %c0_4] : memref<1x8x32xf32, #tpu.memory_space<vmem>>, vector<1x8x32xf32>
    %c8_i32 = arith.constant 8 : i32
    %2 = arith.muli %arg1, %c8_i32 : i32
    %3 = tpu.assume_multiple %2, 8 : i32
    %c2_i32 = arith.constant 2 : i32
    %4 = arith.muli %arg2, %c2_i32 : i32
    %5 = tpu.assume_multiple %4, 2 : i32
    %6 = arith.index_cast %5 : i32 to index
    %7 = arith.index_cast %3 : i32 to index
    %c0_5 = arith.constant 0 : index
    %8 = vector.load %arg5[%6, %7, %c0_5] : memref<2x8x1xf32, #tpu.memory_space<vmem>>, vector<2x8x1xf32>
    %c0_6 = arith.constant 0 : index
    %c0_7 = arith.constant 0 : index
    %9 = vector.load %arg6[%c0_6, %c0_7] : memref<1x16xf32, #tpu.memory_space<vmem>>, vector<1x16xf32>
    %10 = vector.shape_cast %9 : vector<1x16xf32> to vector<1x1x16xf32>
    %11 = vector.broadcast %8 : vector<2x8x1xf32> to vector<2x8x16xf32>
    %12 = vector.broadcast %10 : vector<1x1x16xf32> to vector<2x8x16xf32>
    %13 = arith.mulf %11, %12 : vector<2x8x16xf32>
    %c0_8 = arith.constant 0 : index
    %c0_9 = arith.constant 0 : index
    %14 = vector.load %arg7[%c0_8, %c0_9] : memref<1x16xf32, #tpu.memory_space<vmem>>, vector<1x16xf32>
    %15 = vector.shape_cast %14 : vector<1x16xf32> to vector<1x1x16xf32>
    %16 = vector.broadcast %15 : vector<1x1x16xf32> to vector<2x8x16xf32>
    %17 = arith.addf %13, %16 : vector<2x8x16xf32>
    %cst = arith.constant 5.000000e-01 : f32
    %18 = vector.broadcast %cst : f32 to vector<2x8x16xf32>
    %19 = arith.mulf %18, %17 : vector<2x8x16xf32>
    %cst_10 = arith.constant 0.707106769 : f32
    %20 = vector.broadcast %cst_10 : f32 to vector<2x8x16xf32>
    %21 = arith.mulf %17, %20 : vector<2x8x16xf32>
    %22 = math.erf %21 : vector<2x8x16xf32>
    %cst_11 = arith.constant 1.000000e+00 : f32
    %23 = vector.broadcast %cst_11 : f32 to vector<2x8x16xf32>
    %24 = arith.addf %23, %22 : vector<2x8x16xf32>
    %25 = arith.mulf %19, %24 : vector<2x8x16xf32>
    %26 = vector.shape_cast %25 : vector<2x8x16xf32> to vector<16x16xf32>
    %c0_12 = arith.constant 0 : index
    %c0_13 = arith.constant 0 : index
    %27 = vector.load %arg8[%c0_12, %c0_13] : memref<16x32xf32, #tpu.memory_space<vmem>>, vector<16x32xf32>
    %cst_14 = arith.constant dense<0.000000e+00> : vector<16x32xf32>
    %28 = tpu.matmul %26, %27, %cst_14 {dimension_numbers = #tpu.dot_dimension_numbers<[1], [0], [0], [1], [0, 0, 1, 1], [], []>} : vector<16x16xf32>, vector<16x32xf32>, vector<16x32xf32> -> vector<16x32xf32>
    %29 = vector.shape_cast %28 : vector<16x32xf32> to vector<2x8x32xf32>
    %c0_15 = arith.constant 0 : index
    %c0_16 = arith.constant 0 : index
    %30 = vector.load %arg9[%c0_15, %c0_16] : memref<1x32xf32, #tpu.memory_space<vmem>>, vector<1x32xf32>
    %31 = vector.shape_cast %30 : vector<1x32xf32> to vector<1x1x32xf32>
    %32 = vector.broadcast %31 : vector<1x1x32xf32> to vector<2x8x32xf32>
    %33 = arith.addf %29, %32 : vector<2x8x32xf32>
    %34 = vector.broadcast %1 : vector<1x8x32xf32> to vector<2x8x32xf32>
    %35 = arith.addf %0, %34 : vector<2x8x32xf32>
    %36 = arith.addf %35, %33 : vector<2x8x32xf32>
    %c0_17 = arith.constant 0 : index
    %c0_18 = arith.constant 0 : index
    %c0_19 = arith.constant 0 : index
    %37 = vector.load %arg10[%c0_17, %c0_18, %c0_19] : memref<2x8x32xf32, #tpu.memory_space<vmem>>, vector<2x8x32xf32>
    tpu.vector_store %arg10[%c0_17, %c0_18, %c0_19], %36 {strides = array<i32>} : memref<2x8x32xf32, #tpu.memory_space<vmem>>, vector<2x8x32xf32>,
    return
  }
  func.func @transform_0(%arg0: i32, %arg1: i32, %arg2: i32) -> (i32, i32, i32) {
    %c0_i32 = arith.constant 0 : i32
    return %arg2, %arg1, %arg0 : i32, i32, i32
  }
  func.func @transform_1(%arg0: i32, %arg1: i32, %arg2: i32) -> (i32, i32, i32) {
    %c0_i32 = arith.constant 0 : i32
    %c0_i32_0 = arith.constant 0 : i32
    return %c0_i32, %arg1, %arg0 : i32, i32, i32
  }
  func.func @transform_2(%arg0: i32, %arg1: i32, %arg2: i32) -> (i32, i32, i32) {
    %c0_i32 = arith.constant 0 : i32
    %c0_i32_0 = arith.constant 0 : i32
    %c0_i32_1 = arith.constant 0 : i32
    %c0_i32_2 = arith.constant 0 : i32
    return %c0_i32, %c0_i32_0, %c0_i32_1 : i32, i32, i32
  }
  func.func @transform_3(%arg0: i32, %arg1: i32, %arg2: i32) -> (i32, i32) {
    %c0_i32 = arith.constant 0 : i32
    %c0_i32_0 = arith.constant 0 : i32
    %c0_i32_1 = arith.constant 0 : i32
    return %c0_i32, %c0_i32_0 : i32, i32
  }
  func.func @transform_4(%arg0: i32, %arg1: i32, %arg2: i32) -> (i32, i32) {
    %c0_i32 = arith.constant 0 : i32
    %c0_i32_0 = arith.constant 0 : i32
    %c0_i32_1 = arith.constant 0 : i32
    return %c0_i32, %c0_i32_0 : i32, i32
  }
  func.func @transform_5(%arg0: i32, %arg1: i32, %arg2: i32) -> (i32, i32) {
    %c0_i32 = arith.constant 0 : i32
    %c0_i32_0 = arith.constant 0 : i32
    return %c0_i32, %arg0 : i32, i32
  }
  func.func @transform_6(%arg0: i32, %arg1: i32, %arg2: i32) -> (i32, i32) {
    %c0_i32 = arith.constant 0 : i32
    %c0_i32_0 = arith.constant 0 : i32
    return %c0_i32, %arg0 : i32, i32
  }
  func.func @transform_7(%arg0: i32, %arg1: i32, %arg2: i32) -> (i32, i32, i32) {
    %c0_i32 = arith.constant 0 : i32
    return %arg2, %arg1, %arg0 : i32, i32, i32
  }
}

</mosaic_0001>

<bundles_post_ra>
// kernel: tpu_custom_call.1
= control target key start
LH: loop header
LB: loop body
LE: loop exit
PB: predicated region body
PF: predicated region fallthrough
CT: control target
= control target key end

     0   :  { %12 = vsyncpa [#allocation3], 0  ;;  %s440_s0 = inlined_call_operand.vmem [shape: f32[2,8,32], index: 0, kind: input, shape index: {}]   ;;  %s441_s1 = inlined_call_operand.hbm [shape: f32[1,8,32], index: 1, kind: input, shape index: {}]   ;;  %s442_s2 = inlined_call_operand.vmem [shape: f32[2,8,1], index: 2, kind: input, shape index: {}]   ;;  %s443_s3 = inlined_call_operand.vmem [shape: f32[1,16], index: 3, kind: input, shape index: {}]   ;;  %s444_s4 = inlined_call_operand.vmem [shape: f32[1,16], index: 4, kind: input, shape index: {}]   ;;  %s445_s5 = inlined_call_operand.hbm [shape: f32[16,32], index: 5, kind: input, shape index: {}]   ;;  %s446_s6 = inlined_call_operand.vmem [shape: f32[1,32], index: 6, kind: input, shape index: {}]   ;;  %s447_s7 = inlined_call_operand.hbm [shape: f32[2,8,32], index: 7, kind: output, shape index: {}]  }
   0x1   :  { %13 = vsyncpa [#allocation6], 0 }
   0x2   :  { %14 = vsyncpa [#allocation4], 0  ;;  %s22_s26 = sshll.u32 %s441_s1, 4  ;;  %s340_s27 = smov [#allocation2]   ;;  %s23_s26 = int_to_ptr.hbm [resolvable:$true] %s22_s26 }
   0x3   :  { %s24_s28 = sshll.u32 %s340_s27, 4  ;;  %s38_s8 = sshll.u32 %s445_s5, 4  ;;  %s25_s28 = int_to_ptr.vmem [resolvable:$true] %s24_s28  ;;  %s39_s8 = int_to_ptr.hbm [resolvable:$true] %s38_s8 }
   0x4   :  { %27 = dma.hbm_to_vmem [thread:$0]  %s23_s26, 128, %s25_s28, [#allocation3]  }
   0x5   :  { %s341_s9 = smov [#allocation5]   ;;  %s342_s11 = smov 128  }
   0x6   :  { %s40_s10 = sshll.u32 %s341_s9, 4  ;;  %s343_s12 = smov 8   ;;  %s41_s10 = int_to_ptr.vmem [resolvable:$true] %s40_s10 }
   0x7   :  { %46 = dma.hbm_to_vmem [thread:$0]  %s39_s8, 256, %s41_s10, [#allocation6], %s342_s11, %s342_s11, %s343_s12  }
   0x8   :  { %334 = dma.done.wait [#allocation3], 128  }
   0x9   :  { %335 = vsyncadd [#allocation3], 4294967168 }
   0xa   :  { %336 = dma.done.wait [#allocation6], 256  }
   0xb   :  { %337 = vsyncadd [#allocation6], 4294967040  ;;  %v344_v0 = vmov 0   ;;  %v65_v1 = vld [vmem:[%s442_s2] sm:$0xff]  ;;  %v66_v2 = vld [vmem:[%s442_s2 + $0x8] sm:$0xff]  ;;  %vm179_vm7 = vcmask 130048  }
   0xc   :  { %254 = vset.pattern.permute.xlu0 %v344_v0  ;;  %v255_v3 = vld [vmem:[%s443_s3] ss:$0 sm:$0xff]  ;;  %v178_v10 = vld [vmem:[#allocation5 + $0x8] sm:$0xff]  ;;  %v177_v11 = vld [vmem:[#allocation5] sm:$0xff]  ;;  %vm219_vm9 = vcmask 261120   ;;  %s345_s22 = smov [#allocation7]  }
   0xd   :  { %70 = vperm.xlu0 %254, %v65_v1   ;;  %v256_v4 = vld [vmem:[%s444_s4] ss:$0 sm:$0xff]  ;;  %200 = vmatpush.msra.mxu0 %v178_v10  ;;  %s226_s23 = sshll.u32 %s345_s22, 4  ;;  %s228_s26 = sshll.u32 %s447_s7, 4  ;;  %s227_s23 = int_to_ptr.vmem [resolvable:$true] %s226_s23  ;;  %s229_s26 = int_to_ptr.hbm [resolvable:$true] %s228_s26 }
   0xe   :  { %246 = vmatpush.msra.mxu1 %v178_v10 }
   0xf   :  { %201 = vmatpush.msra.mxu0 %v177_v11 }
  0x10   :  { %247 = vmatpush.msra.mxu1 %v177_v11 }
  0x15   :  { %75 = vperm.xlu0 %254, %v66_v2  }
  0x7f   :  { %v71_v5 = vpop.permute.xlu0 %70 }
  0x80   :  { %v81_v6 = vmul.f32 %v255_v3, %v71_v5 }
  0x82   :  { %v407_v7 = vadd.f32 %v256_v4, %v81_v6 }
  0x84   :  { %v410_v8 = vmul.f32 0.70710677, %v407_v7 }
  0x86   :  { %v93_v9 = vmul.f32 %v410_v8, %v410_v8 }
  0x87   :  { %v76_v12 = vpop.permute.xlu0 %75 }
  0x88   :  { %v94_v13 = vmin.f32 %v93_v9, 16.0  ;;  %v82_v14 = vmul.f32 %v255_v3, %v76_v12 }
  0x8a   :  { %v95_v15 = vmul.f32 2.1237322e-06, %v94_v13  ;;  %v414_v16 = vadd.f32 %v256_v4, %v82_v14  ;;  %v106_v17 = vmul.f32 3.8918573e-05, %v94_v13 }
  0x8c   :  { %v96_v18 = vadd.f32 0.00028619796, %v95_v15  ;;  %v417_v19 = vmul.f32 0.70710677, %v414_v16  ;;  %v107_v20 = vadd.f32 0.001143296, %v106_v17 }
  0x8e   :  { %v97_v21 = vmul.f32 %v96_v18, %v94_v13  ;;  %v133_v22 = vmul.f32 %v417_v19, %v417_v19  ;;  %v108_v23 = vmul.f32 %v107_v20, %v94_v13  ;;  %v89_v18 = vmul.f32 0.5, %v407_v7  ;;  %v57_v7 = vld [vmem:[%s440_s0] sm:$0xff] }
  0x90   :  { %v134_v24 = vmin.f32 %v133_v22, 16.0  ;;  %v109_v25 = vadd.f32 0.014752088, %v108_v23  ;;  %v98_v26 = vadd.f32 0.0036580483, %v97_v21 }
  0x92   :  { %v135_v27 = vmul.f32 2.1237322e-06, %v134_v24  ;;  %v146_v28 = vmul.f32 3.8918573e-05, %v134_v24  ;;  %v110_v29 = vmul.f32 %v109_v25, %v94_v13  ;;  %v99_v33 = vmul.f32 %v98_v26, %v94_v13 }
  0x94   :  { %v136_v30 = vadd.f32 0.00028619796, %v135_v27  ;;  %v147_v31 = vadd.f32 0.001143296, %v146_v28  ;;  %v111_v32 = vadd.f32 0.112945676, %v110_v29 }
  0x95   :  { %v100_v40 = vadd.f32 0.05243302, %v99_v33  ;;  %v90_v27 = vmul.f32 0.5, %v414_v16  ;;  %v58_v16 = vld [vmem:[%s440_s0 + $0x8] sm:$0xff] }
  0x96   :  { %v137_v34 = vmul.f32 %v136_v30, %v134_v24  ;;  %v148_v35 = vmul.f32 %v147_v31, %v134_v24  ;;  %v112_v36 = vmul.f32 %v111_v32, %v94_v13  ;;  %v59_v30 = vld [vmem:[#allocation2] sm:$0xff] }
  0x97   :  { %v101_v46 = vmul.f32 %v100_v40, %v94_v13  ;;  %v215_v31 = vadd.f32 %v59_v30, %v57_v7 }
  0x98   :  { %v149_v37 = vadd.f32 0.014752088, %v148_v35  ;;  %v138_v38 = vadd.f32 0.0036580483, %v137_v34  ;;  %v113_v39 = vadd.f32 0.4994258, %v112_v36  ;;  %v216_v35 = vadd.f32 %v59_v30, %v58_v16 }
  0x99   :  { %v102_v50 = vadd.f32 0.18741608, %v101_v46 }
  0x9a   :  { %v150_v41 = vmul.f32 %v149_v37, %v134_v24  ;;  %v114_v42 = vmul.f32 %v113_v39, %v94_v13  ;;  %v139_v44 = vmul.f32 %v138_v38, %v134_v24 }
  0x9b   :  { %v103_v55 = vmul.f32 %v102_v50, %v94_v13 }
  0x9c   :  { %v151_v43 = vadd.f32 0.112945676, %v150_v41  ;;  %v115_v45 = vadd.f32 1.0, %v114_v42  ;;  %v140_v49 = vadd.f32 0.05243302, %v139_v44 }
  0x9d   :  { %v104_v60 = vadd.f32 1.1283791, %v103_v55 }
  0x9e   :  { %v152_v47 = vmul.f32 %v151_v43, %v134_v24  ;;  %258 = vrcp.f32 %v115_v45  ;;  %v141_v54 = vmul.f32 %v140_v49, %v134_v24  ;;  %v127_v59 = vand.u32 2147483648, %v115_v45 }
  0x9f   :  { %v125_v62 = vand.u32 2147483647, %v115_v45  ;;  %vm121_vm1 = vweird.f32 %v115_v45  ;;  %v105_v4 = vmul.f32 %v104_v60, %v410_v8 }
  0xa0   :  { %v153_v48 = vadd.f32 0.4994258, %v152_v47  ;;  %v142_v58 = vadd.f32 0.18741608, %v141_v54  ;;  %v128_v2 = vor.u32 1.1754944e-38, %v127_v59 }
  0xa1   :  { %vm126_vm3 = vcmp.eq.f32.partialorder %v125_v62, 8.507059e+37 }
  0xa2   :  { %v154_v51 = vmul.f32 %v153_v48, %v134_v24  ;;  %v143_v1 = vmul.f32 %v142_v58, %v134_v24 }
  0xa4   :  { %v155_v52 = vadd.f32 1.0, %v154_v51  ;;  %v259_v53 = vpop.eup %258  ;;  %v144_v12 = vadd.f32 1.1283791, %v143_v1 }
  0xa5   :  { %v117_v56 = vmul.f32 %v259_v53, %v115_v45  ;;  %vm122_vm0 = vweird.f32 %v259_v53 }
  0xa6   :  { %260 = vrcp.f32 %v155_v52  ;;  %vm123_vm2 = vmor %vm121_vm1, %vm122_vm0  ;;  %v167_v11 = vand.u32 2147483648, %v155_v52  ;;  %v165_v14 = vand.u32 2147483647, %v155_v52  ;;  %vm161_vm5 = vweird.f32 %v155_v52 }
  0xa7   :  { %v118_v57 = vsub.f32 1.0, %v117_v56  ;;  %v145_v8 = vmul.f32 %v144_v12, %v417_v19  ;;  %v257_v19 = vld [vmem:[%s446_s6] ss:$0 sm:$0xff] }
  0xa8   :  { %v168_v21 = vor.u32 1.1754944e-38, %v167_v11  ;;  %vm166_vm8 = vcmp.eq.f32.partialorder %v165_v14, 8.507059e+37 }
  0xa9   :  { %v119_v61 = vmul.f32 %v259_v53, %v118_v57 }
  0xab   :  { %v120_v0 = vadd.f32 %v259_v53, %v119_v61 }
  0xac   :  { %v261_v63 = vpop.eup %260 }
  0xad   :  { %v157_v3 = vmul.f32 %v261_v63, %v155_v52  ;;  %v124_v5 = vsel %vm123_vm2, %v259_v53, %v120_v0  ;;  %vm162_vm4 = vweird.f32 %v261_v63 }
  0xae   :  { %v129_v6 = vsel %vm126_vm3, %v128_v2, %v124_v5  ;;  %vm163_vm6 = vmor %vm161_vm5, %vm162_vm4 }
  0xaf   :  { %v158_v9 = vsub.f32 1.0, %v157_v3  ;;  %v130_v10 = vmul.f32 %v129_v6, %v105_v4 }
  0xb1   :  { %v159_v13 = vmul.f32 %v261_v63, %v158_v9  ;;  %v242_v15 = vclamps-f32 %v130_v10, 1.0 }
  0xb3   :  { %v160_v17 = vadd.f32 %v261_v63, %v159_v13  ;;  %v173_v20 = vadd.f32 1.0, %v242_v15 }
  0xb5   :  { %v164_v22 = vsel %vm163_vm6, %v261_v63, %v160_v17  ;;  %v175_v23 = vmul.f32 %v173_v20, %v89_v18 }
  0xb6   :  { %v169_v24 = vsel %vm166_vm8, %v168_v21, %v164_v22 }
  0xb7   :  { %v170_v25 = vmul.f32 %v169_v24, %v145_v8  ;;  %244 = vmatmul.msk.f32.vlgmr.msra.gmra.mxu0 %vm179_vm7, %v175_v23 }
  0xb9   :  { %v243_v26 = vclamps-f32 %v170_v25, 1.0 }
  0xbb   :  { %v174_v28 = vadd.f32 1.0, %v243_v26 }
  0xbd   :  { %v176_v29 = vmul.f32 %v174_v28, %v90_v27 }
  0xbf   :  { %245 = vmatmul.msk.f32.vlgmr.msra.gmra.mxu1 %vm179_vm7, %v176_v29 }
 0x134   :  { %v203_v32 = vpop.f32.mrf.mxu0 }
 0x135   :  { %v213_v33 = vadd.f32 %v257_v19, %v203_v32 }
 0x137   :  { %v217_v34 = vadd.f32 %v215_v31, %v213_v33 }
 0x139   :  { %220 = vst.msk [vmem:[#allocation7] sm:$0xff] %vm219_vm9, %v217_v34 }
 0x13c   :  { %v206_v36 = vpop.f32.mrf.mxu1 }
 0x13d   :  { %v214_v37 = vadd.f32 %v257_v19, %v206_v36 }
 0x13f   :  { %v218_v38 = vadd.f32 %v216_v35, %v214_v37 }
 0x141   :  { %221 = vst.msk [vmem:[#allocation7 + $0x8] sm:$0xff] %vm219_vm9, %v218_v38 }
 0x142   :  { %234 = dma.vmem_to_hbm [thread:$0]  %s227_s23, 256, %s229_s26, [#allocation4], %s342_s11, %s342_s11, %s343_s12  }
 0x143   :  { %338 = dma.done.wait [#allocation4], 256  }
 0x144   :  { %339 = vsyncadd [#allocation4], 4294967040 }
 0x145   :  { %239 = vsyncpa [#allocation3], 1 }
 0x146   :  { %240 = vsyncpa [#allocation6], 1 }
 0x147   :  { %241 = vsyncpa [#allocation4], 1 }

// kernel: tpu_custom_call.1
= control target key start
LH: loop header
LB: loop body
LE: loop exit
PB: predicated region body
PF: predicated region fallthrough
CT: control target
= control target key end

     0   :  { %12 = vsyncpa [#allocation3], 0  ;;  %s440_s0 = inlined_call_operand.vmem [shape: f32[2,8,32], index: 0, kind: input, shape index: {}]   ;;  %s441_s1 = inlined_call_operand.hbm [shape: f32[1,8,32], index: 1, kind: input, shape index: {}]   ;;  %s442_s2 = inlined_call_operand.vmem [shape: f32[2,8,1], index: 2, kind: input, shape index: {}]   ;;  %s443_s3 = inlined_call_operand.vmem [shape: f32[1,16], index: 3, kind: input, shape index: {}]   ;;  %s444_s4 = inlined_call_operand.vmem [shape: f32[1,16], index: 4, kind: input, shape index: {}]   ;;  %s445_s5 = inlined_call_operand.hbm [shape: f32[16,32], index: 5, kind: input, shape index: {}]   ;;  %s446_s6 = inlined_call_operand.vmem [shape: f32[1,32], index: 6, kind: input, shape index: {}]   ;;  %s447_s7 = inlined_call_operand.hbm [shape: f32[2,8,32], index: 7, kind: output, shape index: {}]  }
   0x1   :  { %13 = vsyncpa [#allocation6], 0 }
   0x2   :  { %14 = vsyncpa [#allocation4], 0  ;;  %s22_s26 = sshll.u32 %s441_s1, 4  ;;  %s340_s27 = smov [#allocation2]   ;;  %s23_s26 = int_to_ptr.hbm [resolvable:$true] %s22_s26 }
   0x3   :  { %s24_s28 = sshll.u32 %s340_s27, 4  ;;  %s38_s8 = sshll.u32 %s445_s5, 4  ;;  %s25_s28 = int_to_ptr.vmem [resolvable:$true] %s24_s28  ;;  %s39_s8 = int_to_ptr.hbm [resolvable:$true] %s38_s8 }
   0x4   :  { %27 = dma.hbm_to_vmem [thread:$0]  %s23_s26, 128, %s25_s28, [#allocation3]  }
   0x5   :  { %s341_s9 = smov [#allocation5]   ;;  %s342_s11 = smov 128  }
   0x6   :  { %s40_s10 = sshll.u32 %s341_s9, 4  ;;  %s343_s12 = smov 8   ;;  %s41_s10 = int_to_ptr.vmem [resolvable:$true] %s40_s10 }
   0x7   :  { %46 = dma.hbm_to_vmem [thread:$0]  %s39_s8, 256, %s41_s10, [#allocation6], %s342_s11, %s342_s11, %s343_s12  }
   0x8   :  { %334 = dma.done.wait [#allocation3], 128  }
   0x9   :  { %335 = vsyncadd [#allocation3], 4294967168 }
   0xa   :  { %336 = dma.done.wait [#allocation6], 256  }
   0xb   :  { %337 = vsyncadd [#allocation6], 4294967040  ;;  %v344_v0 = vmov 0   ;;  %v65_v1 = vld [vmem:[%s442_s2] sm:$0xff]  ;;  %v66_v2 = vld [vmem:[%s442_s2 + $0x8] sm:$0xff]  ;;  %vm179_vm7 = vcmask 130048  }
   0xc   :  { %254 = vset.pattern.permute.xlu0 %v344_v0  ;;  %v255_v3 = vld [vmem:[%s443_s3] ss:$0 sm:$0xff]  ;;  %v178_v10 = vld [vmem:[#allocation5 + $0x8] sm:$0xff]  ;;  %v177_v11 = vld [vmem:[#allocation5] sm:$0xff]  ;;  %vm219_vm9 = vcmask 261120   ;;  %s345_s22 = smov [#allocation7]  }
   0xd   :  { %70 = vperm.xlu0 %254, %v65_v1   ;;  %v256_v4 = vld [vmem:[%s444_s4] ss:$0 sm:$0xff]  ;;  %200 = vmatpush.msra.mxu0 %v178_v10  ;;  %s226_s23 = sshll.u32 %s345_s22, 4  ;;  %s228_s26 = sshll.u32 %s447_s7, 4  ;;  %s227_s23 = int_to_ptr.vmem [resolvable:$true] %s226_s23  ;;  %s229_s26 = int_to_ptr.hbm [resolvable:$true] %s228_s26 }
   0xe   :  { %246 = vmatpush.msra.mxu1 %v178_v10 }
   0xf   :  { %201 = vmatpush.msra.mxu0 %v177_v11 }
  0x10   :  { %247 = vmatpush.msra.mxu1 %v177_v11 }
  0x15   :  { %75 = vperm.xlu0 %254, %v66_v2  }
  0x7f   :  { %v71_v5 = vpop.permute.xlu0 %70 }
  0x80   :  { %v81_v6 = vmul.f32 %v255_v3, %v71_v5 }
  0x82   :  { %v407_v7 = vadd.f32 %v256_v4, %v81_v6 }
  0x84   :  { %v410_v8 = vmul.f32 0.70710677, %v407_v7 }
  0x86   :  { %v93_v9 = vmul.f32 %v410_v8, %v410_v8 }
  0x87   :  { %v76_v12 = vpop.permute.xlu0 %75 }
  0x88   :  { %v94_v13 = vmin.f32 %v93_v9, 16.0  ;;  %v82_v14 = vmul.f32 %v255_v3, %v76_v12 }
  0x8a   :  { %v95_v15 = vmul.f32 2.1237322e-06, %v94_v13  ;;  %v414_v16 = vadd.f32 %v256_v4, %v82_v14  ;;  %v106_v17 = vmul.f32 3.8918573e-05, %v94_v13 }
  0x8c   :  { %v96_v18 = vadd.f32 0.00028619796, %v95_v15  ;;  %v417_v19 = vmul.f32 0.70710677, %v414_v16  ;;  %v107_v20 = vadd.f32 0.001143296, %v106_v17 }
  0x8e   :  { %v97_v21 = vmul.f32 %v96_v18, %v94_v13  ;;  %v133_v22 = vmul.f32 %v417_v19, %v417_v19  ;;  %v108_v23 = vmul.f32 %v107_v20, %v94_v13  ;;  %v89_v18 = vmul.f32 0.5, %v407_v7  ;;  %v57_v7 = vld [vmem:[%s440_s0] sm:$0xff] }
  0x90   :  { %v134_v24 = vmin.f32 %v133_v22, 16.0  ;;  %v109_v25 = vadd.f32 0.014752088, %v108_v23  ;;  %v98_v26 = vadd.f32 0.0036580483, %v97_v21 }
  0x92   :  { %v135_v27 = vmul.f32 2.1237322e-06, %v134_v24  ;;  %v146_v28 = vmul.f32 3.8918573e-05, %v134_v24  ;;  %v110_v29 = vmul.f32 %v109_v25, %v94_v13  ;;  %v99_v33 = vmul.f32 %v98_v26, %v94_v13 }
  0x94   :  { %v136_v30 = vadd.f32 0.00028619796, %v135_v27  ;;  %v147_v31 = vadd.f32 0.001143296, %v146_v28  ;;  %v111_v32 = vadd.f32 0.112945676, %v110_v29 }
  0x95   :  { %v100_v40 = vadd.f32 0.05243302, %v99_v33  ;;  %v90_v27 = vmul.f32 0.5, %v414_v16  ;;  %v58_v16 = vld [vmem:[%s440_s0 + $0x8] sm:$0xff] }
  0x96   :  { %v137_v34 = vmul.f32 %v136_v30, %v134_v24  ;;  %v148_v35 = vmul.f32 %v147_v31, %v134_v24  ;;  %v112_v36 = vmul.f32 %v111_v32, %v94_v13  ;;  %v59_v30 = vld [vmem:[#allocation2] sm:$0xff] }
  0x97   :  { %v101_v46 = vmul.f32 %v100_v40, %v94_v13  ;;  %v215_v31 = vadd.f32 %v59_v30, %v57_v7 }
  0x98   :  { %v149_v37 = vadd.f32 0.014752088, %v148_v35  ;;  %v138_v38 = vadd.f32 0.0036580483, %v137_v34  ;;  %v113_v39 = vadd.f32 0.4994258, %v112_v36  ;;  %v216_v35 = vadd.f32 %v59_v30, %v58_v16 }
  0x99   :  { %v102_v50 = vadd.f32 0.18741608, %v101_v46 }
  0x9a   :  { %v150_v41 = vmul.f32 %v149_v37, %v134_v24  ;;  %v114_v42 = vmul.f32 %v113_v39, %v94_v13  ;;  %v139_v44 = vmul.f32 %v138_v38, %v134_v24 }
  0x9b   :  { %v103_v55 = vmul.f32 %v102_v50, %v94_v13 }
  0x9c   :  { %v151_v43 = vadd.f32 0.112945676, %v150_v41  ;;  %v115_v45 = vadd.f32 1.0, %v114_v42  ;;  %v140_v49 = vadd.f32 0.05243302, %v139_v44 }
  0x9d   :  { %v104_v60 = vadd.f32 1.1283791, %v103_v55 }
  0x9e   :  { %v152_v47 = vmul.f32 %v151_v43, %v134_v24  ;;  %258 = vrcp.f32 %v115_v45  ;;  %v141_v54 = vmul.f32 %v140_v49, %v134_v24  ;;  %v127_v59 = vand.u32 2147483648, %v115_v45 }
  0x9f   :  { %v125_v62 = vand.u32 2147483647, %v115_v45  ;;  %vm121_vm1 = vweird.f32 %v115_v45  ;;  %v105_v4 = vmul.f32 %v104_v60, %v410_v8 }
  0xa0   :  { %v153_v48 = vadd.f32 0.4994258, %v152_v47  ;;  %v142_v58 = vadd.f32 0.18741608, %v141_v54  ;;  %v128_v2 = vor.u32 1.1754944e-38, %v127_v59 }
  0xa1   :  { %vm126_vm3 = vcmp.eq.f32.partialorder %v125_v62, 8.507059e+37 }
  0xa2   :  { %v154_v51 = vmul.f32 %v153_v48, %v134_v24  ;;  %v143_v1 = vmul.f32 %v142_v58, %v134_v24 }
  0xa4   :  { %v155_v52 = vadd.f32 1.0, %v154_v51  ;;  %v259_v53 = vpop.eup %258  ;;  %v144_v12 = vadd.f32 1.1283791, %v143_v1 }
  0xa5   :  { %v117_v56 = vmul.f32 %v259_v53, %v115_v45  ;;  %vm122_vm0 = vweird.f32 %v259_v53 }
  0xa6   :  { %260 = vrcp.f32 %v155_v52  ;;  %vm123_vm2 = vmor %vm121_vm1, %vm122_vm0  ;;  %v167_v11 = vand.u32 2147483648, %v155_v52  ;;  %v165_v14 = vand.u32 2147483647, %v155_v52  ;;  %vm161_vm5 = vweird.f32 %v155_v52 }
  0xa7   :  { %v118_v57 = vsub.f32 1.0, %v117_v56  ;;  %v145_v8 = vmul.f32 %v144_v12, %v417_v19  ;;  %v257_v19 = vld [vmem:[%s446_s6] ss:$0 sm:$0xff] }
  0xa8   :  { %v168_v21 = vor.u32 1.1754944e-38, %v167_v11  ;;  %vm166_vm8 = vcmp.eq.f32.partialorder %v165_v14, 8.507059e+37 }
  0xa9   :  { %v119_v61 = vmul.f32 %v259_v53, %v118_v57 }
  0xab   :  { %v120_v0 = vadd.f32 %v259_v53, %v119_v61 }
  0xac   :  { %v261_v63 = vpop.eup %260 }
  0xad   :  { %v157_v3 = vmul.f32 %v261_v63, %v155_v52  ;;  %v124_v5 = vsel %vm123_vm2, %v259_v53, %v120_v0  ;;  %vm162_vm4 = vweird.f32 %v261_v63 }
  0xae   :  { %v129_v6 = vsel %vm126_vm3, %v128_v2, %v124_v5  ;;  %vm163_vm6 = vmor %vm161_vm5, %vm162_vm4 }
  0xaf   :  { %v158_v9 = vsub.f32 1.0, %v157_v3  ;;  %v130_v10 = vmul.f32 %v129_v6, %v105_v4 }
  0xb1   :  { %v159_v13 = vmul.f32 %v261_v63, %v158_v9  ;;  %v242_v15 = vclamps-f32 %v130_v10, 1.0 }
  0xb3   :  { %v160_v17 = vadd.f32 %v261_v63, %v159_v13  ;;  %v173_v20 = vadd.f32 1.0, %v242_v15 }
  0xb5   :  { %v164_v22 = vsel %vm163_vm6, %v261_v63, %v160_v17  ;;  %v175_v23 = vmul.f32 %v173_v20, %v89_v18 }
  0xb6   :  { %v169_v24 = vsel %vm166_vm8, %v168_v21, %v164_v22 }
  0xb7   :  { %v170_v25 = vmul.f32 %v169_v24, %v145_v8  ;;  %244 = vmatmul.msk.f32.vlgmr.msra.gmra.mxu0 %vm179_vm7, %v175_v23 }
  0xb9   :  { %v243_v26 = vclamps-f32 %v170_v25, 1.0 }
  0xbb   :  { %v174_v28 = vadd.f32 1.0, %v243_v26 }
  0xbd   :  { %v176_v29 = vmul.f32 %v174_v28, %v90_v27 }
  0xbf   :  { %245 = vmatmul.msk.f32.vlgmr.msra.gmra.mxu1 %vm179_vm7, %v176_v29 }
 0x134   :  { %v203_v32 = vpop.f32.mrf.mxu0 }
 0x135   :  { %v213_v33 = vadd.f32 %v257_v19, %v203_v32 }
 0x137   :  { %v217_v34 = vadd.f32 %v215_v31, %v213_v33 }
 0x139   :  { %220 = vst.msk [vmem:[#allocation7] sm:$0xff] %vm219_vm9, %v217_v34 }
 0x13c   :  { %v206_v36 = vpop.f32.mrf.mxu1 }
 0x13d   :  { %v214_v37 = vadd.f32 %v257_v19, %v206_v36 }
 0x13f   :  { %v218_v38 = vadd.f32 %v216_v35, %v214_v37 }
 0x141   :  { %221 = vst.msk [vmem:[#allocation7 + $0x8] sm:$0xff] %vm219_vm9, %v218_v38 }
 0x142   :  { %234 = dma.vmem_to_hbm [thread:$0]  %s227_s23, 256, %s229_s26, [#allocation4], %s342_s11, %s342_s11, %s343_s12  }
 0x143   :  { %338 = dma.done.wait [#allocation4], 256  }
 0x144   :  { %339 = vsyncadd [#allocation4], 4294967040 }
 0x145   :  { %239 = vsyncpa [#allocation3], 1 }
 0x146   :  { %240 = vsyncpa [#allocation6], 1 }
 0x147   :  { %241 = vsyncpa [#allocation4], 1 }

</bundles_post_ra>
